<compile_context>
chip_gen: v6e
topology: v6e:2x2x1
jax: 0.10.0
libtpu: 0.0.40
codegen_flags: <defaults>
</compile_context>

<pallas_src>
import functools

import jax
import jax.numpy as jnp
from jax.experimental import pallas as pl
from jax.experimental.pallas import tpu as pltpu


def _round_up(x, m):
    return (x + m - 1) // m * m


# ----------------------------- Pallas matmul kernel -------------------------

_COLLAPSE_MAX_K = 4096           # keep tk <= 4096 so tiles fit v7x VMEM comfortably
_VMEM_TILE_BUDGET = 10 << 20     # bytes for double-buffered A+B tiles (fits v5e default)


def _make_mm_kernel(nk, have_bias, want_stats):
    """Matmul kernel with optional fused bias+sigmoid and per-channel stats epilogue."""

    def kernel(*refs):
        it = iter(refs)
        a_ref = next(it)
        b_ref = next(it)
        bias_ref = next(it) if have_bias else None
        o_ref = next(it)
        s_ref = next(it) if want_stats else None
        q_ref = next(it) if want_stats else None
        acc_ref = next(it) if nk > 1 else None

        def finalize(acc):
            y = acc
            if have_bias:
                y = y + bias_ref[...]
                y = 1.0 / (1.0 + jnp.exp(-y))        # fused bias + sigmoid epilogue
            o_ref[...] = y.astype(o_ref.dtype)
            if want_stats:
                cs = jnp.sum(acc, axis=0, keepdims=True)
                cq = jnp.sum(acc * acc, axis=0, keepdims=True)
                # (1, tn) partial broadcast over the 8-row block; the JAX-side
                # reduction divides by 8 (exact).
                s_ref[...] = jnp.broadcast_to(cs, s_ref.shape)
                q_ref[...] = jnp.broadcast_to(cq, q_ref.shape)

        if nk == 1:
            finalize(jnp.dot(a_ref[...], b_ref[...],
                             preferred_element_type=jnp.float32))
        else:
            @pl.when(pl.program_id(2) == 0)
            def _():
                acc_ref[...] = jnp.zeros_like(acc_ref)

            acc_ref[...] += jnp.dot(a_ref[...], b_ref[...],
                                    preferred_element_type=jnp.float32)

            @pl.when(pl.program_id(2) == nk - 1)
            def _():
                finalize(acc_ref[...])

    return kernel


def matmul(a, b_padded, n_valid, *, bias=None, want_stats=False,
           out_dtype=jnp.bfloat16):
    """(M, Kp) @ pre-packed bf16 weight (Kp, Np) -> (M, n_valid) [+ channel stats].

    The caller supplies A already K-padded to the packed weight width.  Optional
    fused bias+sigmoid epilogue (network head) and per-output-channel sum/sumsq
    (consumed by BatchNorm, so conv outputs are not re-read for statistics).
    """
    M, K = a.shape
    Kp, Np = b_padded.shape
    assert K == Kp, "A must be K-padded to the packed weight width"

    tn = 512 if Np % 512 == 0 else (256 if Np % 256 == 0 else 128)
    if M <= 256:
        tm = max(8, _round_up(M, 8))          # tiny-M encoder GEMMs: 1 row tile
    elif M % 512 == 0:
        tm = 512
    elif M % 256 == 0:
        tm = 256
    elif M % 128 == 0:
        tm = 128
    else:
        tm = 256

    if Kp <= _COLLAPSE_MAX_K and (tm * Kp + Kp * tn) * 2 * 2 <= _VMEM_TILE_BUDGET:
        tk, nk = Kp, 1                        # K collapsed: single dot, 2-D grid
    else:
        tk = 512 if Kp % 512 == 0 else (256 if Kp % 256 == 0 else 128)
        nk = Kp // tk

    mi = pl.cdiv(M, tm)
    nj = Np // tn
    Mp = mi * tm

    a = a.astype(jnp.bfloat16)
    if Mp != M:
        a = jnp.pad(a, ((0, Mp - M), (0, 0)))  # zero rows keep channel stats exact

    have_bias = bias is not None

    out_shape = [jax.ShapeDtypeStruct((Mp, Np), out_dtype)]
    if want_stats:
        out_shape += [jax.ShapeDtypeStruct((mi * 8, Np), jnp.float32)] * 2
    out_shape = tuple(out_shape)

    if nk == 1:
        # M innermost -> the weight block index is constant over the row sweep and
        # stays resident in VMEM (no per-row-tile weight re-fetch).
        grid = (nj, mi)
        a_spec = pl.BlockSpec((tm, tk), lambda j, i: (i, 0))
        b_spec = pl.BlockSpec((tk, tn), lambda j, i: (0, j))
        bias_spec = pl.BlockSpec((1, tn), lambda j, i: (0, j))
        o_spec = pl.BlockSpec((tm, tn), lambda j, i: (i, j))
        st_spec = pl.BlockSpec((8, tn), lambda j, i: (i, j))
        scratch = []
        dims = ("parallel", "parallel")
    else:
        grid = (nj, mi, nk)
        a_spec = pl.BlockSpec((tm, tk), lambda j, i, k: (i, k))
        b_spec = pl.BlockSpec((tk, tn), lambda j, i, k: (k, j))
        bias_spec = pl.BlockSpec((1, tn), lambda j, i, k: (0, j))
        o_spec = pl.BlockSpec((tm, tn), lambda j, i, k: (i, j))
        st_spec = pl.BlockSpec((8, tn), lambda j, i, k: (i, j))
        scratch = [pltpu.VMEM((tm, tn), jnp.float32)]
        dims = ("parallel", "parallel", "arbitrary")

    in_specs = [a_spec, b_spec]
    args = [a, b_padded]
    if have_bias:
        in_specs.append(bias_spec)
        args.append(bias)
    out_specs = [o_spec] + ([st_spec, st_spec] if want_stats else [])

    res = pl.pallas_call(
        _make_mm_kernel(nk, have_bias, want_stats),
        out_shape=out_shape,
        grid=grid,
        in_specs=in_specs,
        out_specs=tuple(out_specs),
        scratch_shapes=scratch,
        compiler_params=pltpu.CompilerParams(dimension_semantics=dims),
    )(*args)

    out = res[0]
    if (Mp, Np) != (M, n_valid):
        out = out[:M, :n_valid]
    if not want_stats:
        return out
    s = res[1].sum(axis=0) * 0.125
    q = res[2].sum(axis=0) * 0.125
    return out, s[:n_valid], q[:n_valid]


# ----------------------- Pallas fused BN-affine kernels ----------------------

def _pick_block_rows(R, C, nbuf, itemsize=2):
    # keep the sum of double-buffered blocks around <=12 MiB (fits v5e's default
    # scoped VMEM); slabs are bf16 so use the real item size.
    per_buf = (12 << 20) // (2 * nbuf)
    rows = per_buf // (itemsize * C)
    rows = max(8, min(1024, rows - rows % 8))
    return min(rows, _round_up(R, 8))


def _affine_kernel(x_ref, s_ref, b_ref, o_ref, *, act):
    y = x_ref[...].astype(jnp.float32) * s_ref[...] + b_ref[...]
    if act == "relu":
        y = jnp.maximum(y, 0.0)
    o_ref[...] = y.astype(o_ref.dtype)


def _affine_res_relu_kernel(x_ref, r_ref, s_ref, b_ref, o_ref):
    y = (x_ref[...].astype(jnp.float32) * s_ref[...] + b_ref[...]
         + r_ref[...].astype(jnp.float32))
    o_ref[...] = jnp.maximum(y, 0.0).astype(o_ref.dtype)


def affine(x2d, scale, shift, residual=None, act="none", out_dtype=jnp.bfloat16):
    """Fused y = act(x * scale + shift [+ residual]) over a (R, C) slab."""
    R, C = x2d.shape
    nbuf = 2 if residual is None else 3
    br = _pick_block_rows(R, C, nbuf)
    grid = (pl.cdiv(R, br),)                       # masked boundary block, no padding
    row_spec = pl.BlockSpec((br, C), lambda i: (i, 0))
    vec_spec = pl.BlockSpec((1, C), lambda i: (0, 0))
    s2 = scale.reshape(1, C).astype(jnp.float32)
    b2 = shift.reshape(1, C).astype(jnp.float32)
    cparams = pltpu.CompilerParams(dimension_semantics=("parallel",))
    if residual is None:
        return pl.pallas_call(
            functools.partial(_affine_kernel, act=act),
            out_shape=jax.ShapeDtypeStruct((R, C), out_dtype),
            grid=grid,
            in_specs=[row_spec, vec_spec, vec_spec],
            out_specs=row_spec,
            compiler_params=cparams,
        )(x2d, s2, b2)
    return pl.pallas_call(
        _affine_res_relu_kernel,
        out_shape=jax.ShapeDtypeStruct((R, C), out_dtype),
        grid=grid,
        in_specs=[row_spec, row_spec, vec_spec, vec_spec],
        out_specs=row_spec,
        compiler_params=cparams,
    )(x2d, residual, s2, b2)


def apply_bn(y, s, q, gamma, beta, relu=True, residual=None, eps=1e-5):
    """BatchNorm2d with batch statistics (track_running_stats=False); the per-channel
    sum/sumsq come from the conv matmul epilogue.  Optionally fused residual+ReLU."""
    N, H, W, C = y.shape
    R = N * H * W
    mean = s / R
    # TODO(synk): E[x^2]-E[x]^2 in f32; switch to a shifted formulation if accuracy drifts.
    var = jnp.maximum(q / R - mean * mean, 0.0)
    scale = gamma * jax.lax.rsqrt(var + eps)
    shift = beta - mean * scale

    rep = 1
    if C < 128 and 128 % C == 0 and R % (128 // C) == 0:
        rep = 128 // C                          # lane-densify small-C slabs (64 -> 128)
    x2 = y.reshape(R // rep, C * rep)
    if rep > 1:
        scale = jnp.tile(scale, rep)
        shift = jnp.tile(shift, rep)
    r2 = None if residual is None else residual.reshape(R // rep, C * rep)
    out = affine(x2, scale, shift, residual=r2, act="relu" if relu else "none")
    return out.reshape(N, H, W, C)


# --------------------------- network building blocks ------------------------

def prep_conv(w):
    """Reshape/pad/cast a (kh,kw,cin,cout) conv weight to a matmul-ready bf16 (Kp,Np)."""
    kh, kw, cin, cout = w.shape
    K = kh * kw * cin
    Kp = _round_up(K, 128)
    Np = _round_up(cout, 128)
    w2 = w.reshape(K, cout).astype(jnp.bfloat16)
    if (Kp, Np) != (K, cout):
        w2 = jnp.pad(w2, ((0, Kp - K), (0, Np - cout)))
    return {"w": w2, "kh": kh, "kw": kw, "cin": cin, "cout": cout}


def conv2d(x, wp, stride=1, pad=0, extra=None, want_stats=False):
    """NHWC bf16 conv.  1x1 convs go straight to the matmul; kh>1 builds an im2col
    matrix (zero K-padding folded into the same concatenate).  `extra` is a second
    input concatenated along channels per tap, so the decoder's wide concat tensor
    is never materialized on its own."""
    N, H, W, Cin = x.shape
    kh, kw, cout = wp["kh"], wp["kw"], wp["cout"]
    Kp = wp["w"].shape[0]

    if kh == 1 and kw == 1 and pad == 0 and extra is None:
        if stride > 1:
            # TODO(synk): fold this subsampling into the matmul A BlockSpec (strided pl.ds).
            x = x[:, ::stride, ::stride, :]
        _, OH, OW, _ = x.shape
        a = x.reshape(N * OH * OW, Cin)
        if Cin != Kp:
            a = jnp.pad(a, ((0, 0), (0, Kp - Cin)))
    else:
        # TODO(synk): replace im2col with an implicit-GEMM halo-tile Pallas conv
        # (DMA a halo'd NHWC tile, accumulate kh*kw shifted matmuls in VMEM) to remove
        # the kh*kw HBM expansion entirely.
        inputs = [x] if extra is None else [x, extra]
        if pad:
            inputs = [jnp.pad(t, ((0, 0), (pad, pad), (pad, pad), (0, 0)))
                      for t in inputs]
        Hp, Wq = H + 2 * pad, W + 2 * pad
        OH = (Hp - kh) // stride + 1
        OW = (Wq - kw) // stride + 1
        cols = []
        for i in range(kh):
            for j in range(kw):
                for t in inputs:
                    cols.append(t[:, i:i + (OH - 1) * stride + 1:stride,
                                  j:j + (OW - 1) * stride + 1:stride, :])
        K = kh * kw * (Cin if extra is None else Cin + extra.shape[-1])
        if Kp > K:
            cols.append(jnp.zeros((N, OH, OW, Kp - K), x.dtype))
        a = jnp.concatenate(cols, axis=-1).reshape(N * OH * OW, Kp)

    res = matmul(a, wp["w"], n_valid=cout, want_stats=want_stats)
    if want_stats:
        y, s, q = res
        return y.reshape(N, OH, OW, cout), s, q
    return res.reshape(N, OH, OW, cout)


def bottleneck(x, p):
    st = p["stride"]
    y, s1, q1 = conv2d(x, p["conv1"], want_stats=True)
    y = apply_bn(y, s1, q1, *p["bn1"])
    y, s2, q2 = conv2d(y, p["conv2"], stride=st, pad=1, want_stats=True)
    y = apply_bn(y, s2, q2, *p["bn2"])
    y, s3, q3 = conv2d(y, p["conv3"], want_stats=True)
    if "down" in p:
        # the reference _make_layer builds a bare 1x1 conv shortcut (no BN)
        res = conv2d(x, p["down"], stride=st)
    else:
        res = x
    # bn3 (no ReLU) + residual add + ReLU fused in one elementwise kernel
    return apply_bn(y, s3, q3, *p["bn3"], residual=res)


def run_layer(x, blocks):
    for p in blocks:
        x = bottleneck(x, p)
    return x


def psp_upsample(x, addition, p):
    """Assumed PSPUpsample: 2x bilinear upsample -> concat -> 3x3 conv -> BN -> ReLU.
    The concat tensor is never materialized: both inputs are fed to conv2d and
    interleaved per tap inside the im2col matrix."""
    N, H, W, C = x.shape
    _, Ha, Wa, _ = addition.shape
    # TODO(synk): jax.image.resize is plain-JAX glue; a 4-tap Pallas upsample kernel
    # (or folding the 2x upsample into the conv input tiles) would remove this pass.
    xu = jax.image.resize(x, (N, Ha, Wa, C), method="bilinear")
    y, s, q = conv2d(xu, p["conv"], stride=1, pad=1, extra=addition, want_stats=True)
    return apply_bn(y, s, q, *p["bn"])


# ------------------------------- parameters ---------------------------------

def _xavier_conv(key, kh, kw, cin, cout):
    fan_in = kh * kw * cin
    fan_out = kh * kw * cout
    limit = (6.0 / (fan_in + fan_out)) ** 0.5
    return jax.random.uniform(key, (kh, kw, cin, cout), jnp.float32, -limit, limit)


def init_params(seed=0):
    root = jax.random.PRNGKey(seed)
    ctr = [0]

    def nk():
        ctr[0] += 1
        return jax.random.fold_in(root, ctr[0])

    def conv(kh, kw, cin, cout):
        return prep_conv(_xavier_conv(nk(), kh, kw, cin, cout))

    def bn(c):
        return (jnp.ones((c,), jnp.float32), jnp.zeros((c,), jnp.float32))

    P = {}
    P["conv1"] = conv(7, 7, 3, 64)
    P["bn1"] = bn(64)

    inplanes = 64

    def make_layer(planes, blocks, stride):
        nonlocal inplanes
        layer = []
        for b in range(blocks):
            s = stride if b == 0 else 1
            blk = {"stride": s,
                   "conv1": conv(1, 1, inplanes, planes),
                   "bn1": bn(planes),
                   "conv2": conv(3, 3, planes, planes),
                   "bn2": bn(planes),
                   "conv3": conv(1, 1, planes, planes * 4),
                   "bn3": bn(planes * 4)}
            if b == 0 and (s != 1 or inplanes != planes * 4):
                blk["down"] = conv(1, 1, inplanes, planes * 4)
            layer.append(blk)
            inplanes = planes * 4
        return layer

    P["layer1"] = make_layer(64, 3, 1)
    P["layer2"] = make_layer(128, 4, 2)
    P["layer3"] = make_layer(256, 6, 2)
    P["layer4"] = make_layer(512, 3, 2)

    P["layer4_reduce"] = conv(1, 1, 2048, 512)
    P["layer4_reduce_bn"] = bn(512)
    P["layer3_reduce"] = conv(1, 1, 1024, 512)
    P["layer3_reduce_bn"] = bn(512)

    P["up1"] = {"conv": conv(3, 3, 512 + 512, 512), "bn": bn(512)}
    P["up2"] = {"conv": conv(3, 3, 512 + 512, 256), "bn": bn(256)}
    P["up3"] = {"conv": conv(3, 3, 256 + 64, 128), "bn": bn(128)}
    P["up4"] = {"conv": conv(3, 3, 128 + 3, 64), "bn": bn(64)}

    P["last_conv"] = conv(1, 1, 64, 2)
    b = jax.random.uniform(nk(), (2,), jnp.float32, -0.125, 0.125)
    P["last_b"] = jnp.pad(b.reshape(1, 2), ((0, 0), (0, 126)))   # padded to Np=128
    return P


# ------------------------------- forward pass -------------------------------

def dh_segment_forward(x_nchw, P):
    # NCHW -> NHWC, bf16 activations throughout (f32 compute inside kernels)
    x1 = jnp.transpose(x_nchw, (0, 2, 3, 1)).astype(jnp.bfloat16)

    y, s, q = conv2d(x1, P["conv1"], stride=2, pad=3, want_stats=True)
    x2 = apply_bn(y, s, q, *P["bn1"])

    x3 = run_layer(x2, P["layer1"])
    x3 = run_layer(x3, P["layer2"])
    x4 = run_layer(x3, P["layer3"])
    x5 = run_layer(x4, P["layer4"])

    y, s, q = conv2d(x5, P["layer4_reduce"], want_stats=True)
    x5 = apply_bn(y, s, q, *P["layer4_reduce_bn"])
    y, s, q = conv2d(x4, P["layer3_reduce"], want_stats=True)
    x4 = apply_bn(y, s, q, *P["layer3_reduce_bn"])

    x4 = psp_upsample(x5, x4, P["up1"])
    x3 = psp_upsample(x4, x3, P["up2"])
    x2 = psp_upsample(x3, x2, P["up3"])
    x1 = psp_upsample(x2, x1, P["up4"])

    # last 1x1 conv (with bias) + sigmoid fused into the matmul epilogue
    N, H, W, C = x1.shape
    a = x1.reshape(N * H * W, C)
    Kp = P["last_conv"]["w"].shape[0]
    if C != Kp:
        a = jnp.pad(a, ((0, 0), (0, Kp - C)))
    prob = matmul(a, P["last_conv"]["w"], n_valid=2,
                  bias=P["last_b"], out_dtype=jnp.float32)
    prob = prob.reshape(N, H, W, 2)
    return jnp.transpose(prob, (0, 3, 1, 2))            # NHWC -> NCHW


# ----------------------------------- main ------------------------------------

if __name__ == "__main__":
    key = jax.random.PRNGKey(0)
    x = jax.random.normal(key, (2, 3, 32, 32), jnp.float32)   # NCHW like PyTorch
    params = init_params(0)
    out = dh_segment_forward(x, params)
    out = jax.block_until_ready(out)
    assert out.shape == (2, 2, 32, 32), out.shape
    assert bool(jnp.all(jnp.isfinite(out)))
    assert bool(jnp.all(out >= 0.0)) and bool(jnp.all(out <= 1.0))
    print("KERNEL_OK")
</pallas_src>

<mosaic_0001>
module attributes {stable_mosaic.version = 11 : i64} {
  func.func @kernel(%arg0: i32, %arg1: i32, %arg2: memref<512x256xbf16, #tpu.memory_space<vmem>>, %arg3: memref<256x128xbf16, #tpu.memory_space<vmem>>, %arg4: memref<512x128xbf16, #tpu.memory_space<vmem>>, %arg5: memref<8x128xf32, #tpu.memory_space<vmem>>, %arg6: memref<8x128xf32, #tpu.memory_space<vmem>>) attributes {dimension_semantics = [#tpu.dimension_semantics<parallel>, #tpu.dimension_semantics<parallel>], iteration_bounds = array<i64: 1, 1>, scalar_prefetch = 0 : i64, scratch_operands = 0 : i64, tpu.core_type = #tpu.core_type<tc>, window_params = [{transform_indices = @transform_0, window_bounds = array<i64: 512, 256>}, {transform_indices = @transform_1, window_bounds = array<i64: 256, 128>}, {transform_indices = @transform_2, window_bounds = array<i64: 512, 128>}, {transform_indices = @transform_3, window_bounds = array<i64: 8, 128>}, {transform_indices = @transform_4, window_bounds = array<i64: 8, 128>}]} {
    %c0 = arith.constant 0 : index
    %c0_0 = arith.constant 0 : index
    %0 = vector.load %arg2[%c0, %c0_0] : memref<512x256xbf16, #tpu.memory_space<vmem>>, vector<512x256xbf16>
    %c0_1 = arith.constant 0 : index
    %c0_2 = arith.constant 0 : index
    %1 = vector.load %arg3[%c0_1, %c0_2] : memref<256x128xbf16, #tpu.memory_space<vmem>>, vector<256x128xbf16>
    %cst = arith.constant dense<0.000000e+00> : vector<512x128xf32>
    %2 = tpu.matmul %0, %1, %cst {dimension_numbers = #tpu.dot_dimension_numbers<[1], [0], [0], [1], [0, 0, 1, 1], [], []>} : vector<512x256xbf16>, vector<256x128xbf16>, vector<512x128xf32> -> vector<512x128xf32>
    %3 = arith.truncf %2 : vector<512x128xf32> to vector<512x128xbf16>
    %c0_3 = arith.constant 0 : index
    %c0_4 = arith.constant 0 : index
    %4 = vector.load %arg4[%c0_3, %c0_4] : memref<512x128xbf16, #tpu.memory_space<vmem>>, vector<512x128xbf16>
    tpu.vector_store %arg4[%c0_3, %c0_4], %3 {strides = array<i32>} : memref<512x128xbf16, #tpu.memory_space<vmem>>, vector<512x128xbf16>,
    %cst_5 = arith.constant dense<0.000000e+00> : vector<128xf32>
    %5 = vector.multi_reduction <add>, %2, %cst_5 [0] : vector<512x128xf32> to vector<128xf32>
    %6 = vector.shape_cast %5 : vector<128xf32> to vector<1x128xf32>
    %7 = arith.mulf %2, %2 : vector<512x128xf32>
    %cst_6 = arith.constant dense<0.000000e+00> : vector<128xf32>
    %8 = vector.multi_reduction <add>, %7, %cst_6 [0] : vector<512x128xf32> to vector<128xf32>
    %9 = vector.shape_cast %8 : vector<128xf32> to vector<1x128xf32>
    %10 = vector.shape_cast %6 : vector<1x128xf32> to vector<1x128xf32>
    %11 = vector.broadcast %10 : vector<1x128xf32> to vector<8x128xf32>
    %c0_7 = arith.constant 0 : index
    %c0_8 = arith.constant 0 : index
    %12 = vector.load %arg5[%c0_7, %c0_8] : memref<8x128xf32, #tpu.memory_space<vmem>>, vector<8x128xf32>
    tpu.vector_store %arg5[%c0_7, %c0_8], %11 {strides = array<i32>} : memref<8x128xf32, #tpu.memory_space<vmem>>, vector<8x128xf32>,
    %13 = vector.shape_cast %9 : vector<1x128xf32> to vector<1x128xf32>
    %14 = vector.broadcast %13 : vector<1x128xf32> to vector<8x128xf32>
    %c0_9 = arith.constant 0 : index
    %c0_10 = arith.constant 0 : index
    %15 = vector.load %arg6[%c0_9, %c0_10] : memref<8x128xf32, #tpu.memory_space<vmem>>, vector<8x128xf32>
    tpu.vector_store %arg6[%c0_9, %c0_10], %14 {strides = array<i32>} : memref<8x128xf32, #tpu.memory_space<vmem>>, vector<8x128xf32>,
    return
  }
  func.func @transform_0(%arg0: i32, %arg1: i32) -> (i32, i32) {
    %c0_i32 = arith.constant 0 : i32
    %c0_i32_0 = arith.constant 0 : i32
    return %arg1, %c0_i32 : i32, i32
  }
  func.func @transform_1(%arg0: i32, %arg1: i32) -> (i32, i32) {
    %c0_i32 = arith.constant 0 : i32
    %c0_i32_0 = arith.constant 0 : i32
    return %c0_i32, %arg0 : i32, i32
  }
  func.func @transform_2(%arg0: i32, %arg1: i32) -> (i32, i32) {
    %c0_i32 = arith.constant 0 : i32
    return %arg1, %arg0 : i32, i32
  }
  func.func @transform_3(%arg0: i32, %arg1: i32) -> (i32, i32) {
    %c0_i32 = arith.constant 0 : i32
    return %arg1, %arg0 : i32, i32
  }
  func.func @transform_4(%arg0: i32, %arg1: i32) -> (i32, i32) {
    %c0_i32 = arith.constant 0 : i32
    return %arg1, %arg0 : i32, i32
  }
}

</mosaic_0001>

<bundles_post_ra>
// kernel: tpu_custom_call.1
= control target key start
LH: loop header
LB: loop body
LE: loop exit
PB: predicated region body
PF: predicated region fallthrough
CT: control target
= control target key end

     0   :  { %10 = vsyncpa [#allocation3], 0  ;;  %s2488_s0 = inlined_call_operand.hbm [shape: bf16[512,256], index: 0, kind: input, shape index: {}]   ;;  %s2489_s1 = inlined_call_operand.hbm [shape: bf16[256,128], index: 1, kind: input, shape index: {}]   ;;  %s2490_s2 = inlined_call_operand.hbm [shape: bf16[512,128], index: 2, kind: output, shape index: {0}]   ;;  %s2491_s3 = inlined_call_operand.hbm [shape: f32[8,128], index: 3, kind: output, shape index: {1}]   ;;  %s2492_s4 = inlined_call_operand.hbm [shape: f32[8,128], index: 4, kind: output, shape index: {2}]  }
   0x1   :  { %11 = vsyncpa [#allocation6], 0 }
   0x2   :  { %12 = vsyncpa [#allocation4], 0 }
   0x3   :  { %13 = vsyncpa [#allocation9], 0  ;;  %s2076_s15 = smov [#allocation2]  }
   0x4   :  { %s19_s16 = sshll.u32 %s2076_s15, 4  ;;  %s20_s16 = int_to_ptr.vmem [resolvable:$true] %s19_s16 }
   0x5   :  { %s1976_s17 = scalar_lea.vmem %s20_s16, 8192  ;;  %p1981_p1 = scmp.lt.s32.totalorder %s20_s16, %s20_s16 }
   0x6   :  { %p1977_p0 = scmp.ne.s32.totalorder %s20_s16, %s1976_s17  ;;  %p1982_p2 = scmp.lt.s32.totalorder %s1976_s17, %s1976_s17 }
   0x8   :  { %p1983_p3 = por %p1982_p2, %p1981_p1 }
   0xa   :  { %p1984_p4 = pnand %p1983_p3, %p1977_p0 }
   0xc   :  { %1987 = shalt.err (!%p1984_p4)
}
   0xd   :  { %s2077_s18 = smov 128   ;;  %s2078_s19 = smov 8  }
   0xe   :  { %25 = dma.hbm_to_vmem [thread:$0]  %s2488_s0, 8192, %s20_s16, [#allocation3], %s2077_s18, %s2077_s18, %s2078_s19  }
   0xf   :  { %s2079_s22 = smov [#allocation5]  }
  0x10   :  { %s31_s23 = sshll.u32 %s2079_s22, 4  ;;  %s32_s23 = int_to_ptr.vmem [resolvable:$true] %s31_s23 }
  0x11   :  { %s1996_s24 = scalar_lea.vmem %s32_s23, 2048  ;;  %p2001_p6 = scmp.lt.s32.totalorder %s32_s23, %s32_s23 }
  0x12   :  { %p1997_p5 = scmp.ne.s32.totalorder %s32_s23, %s1996_s24  ;;  %p2002_p7 = scmp.lt.s32.totalorder %s1996_s24, %s1996_s24 }
  0x14   :  { %p2003_p8 = por %p2002_p7, %p2001_p6 }
  0x16   :  { %p2004_p9 = pnand %p2003_p8, %p1997_p5 }
  0x18   :  { %2007 = shalt.err (!%p2004_p9)
}
  0x19   :  { %s2080_s25 = smov 64   ;;  %s2081_s26 = smov 4  }
  0x1a   :  { %37 = dma.hbm_to_vmem [thread:$0]  %s2489_s1, 2048, %s32_s23, [#allocation6], %s2080_s25, %s2080_s25, %s2081_s26  }
  0x1b   :  { %2068 = dma.done.wait [#allocation3], 8192  }
  0x1c   :  { %2069 = vsyncadd [#allocation3], 4294959104 }
  0x1d   :  { %2070 = dma.done.wait [#allocation6], 2048  }
  0x1e   :  { %2071 = vsyncadd [#allocation6], 4294965248  ;;  %v2082_v0 = vmov 0   ;;  %v1856_v1 = vld [vmem:[#allocation5 + $0x38] sm:$0xff]   ;;  %v1857_v2 = vld [vmem:[#allocation5 + $0x30] sm:$0xff]   ;;  %s2083_s0 = smov [#allocation7]  }
  0x1f   :  { %557 = vmatprep.subr.bf16.mxu0 %v2082_v0  ;;  %1814 = vmatprep.subr.bf16.mxu1 %v2082_v0  ;;  %v1858_v3 = vld [vmem:[#allocation5 + $0x28] sm:$0xff]   ;;  %v1859_v4 = vld [vmem:[#allocation5 + $0x20] sm:$0xff]   ;;  %v1860_v5 = vld [vmem:[#allocation5 + $0x18] sm:$0xff]   ;;  %s1375_s1 = sshll.u32 %s2083_s0, 4  ;;  %s1376_s1 = int_to_ptr.vmem [resolvable:$true] %s1375_s1 }
  0x20   :  { %558 = vmatpush1.bf16.msra.mxu0 %v1856_v1  ;;  %1830 = vmatpush1.bf16.msra.mxu1 %v1856_v1  ;;  %v1874_v6 = vld [vmem:[#allocation2 + $0x4] ss:$8 sps:$4 sm:$0xff]   ;;  %v1861_v7 = vld [vmem:[#allocation5 + $0x10] sm:$0xff]   ;;  %v1864_v11 = vld [vmem:[#allocation5 + $0x78] sm:$0xff]   ;;  %s2008_s29 = scalar_lea.vmem %s1376_s1, 4096  ;;  %p2013_p11 = scmp.lt.s32.totalorder %s1376_s1, %s1376_s1 }
  0x21   :  { %559 = vmatprep.subr.bf16.mxu0 %v2082_v0  ;;  %1815 = vmatprep.subr.bf16.mxu1 %v2082_v0  ;;  %v1862_v8 = vld [vmem:[#allocation5 + $0x8] sm:$0xff]   ;;  %v1863_v9 = vld [vmem:[#allocation5] sm:$0xff]   ;;  %v1865_v12 = vld [vmem:[#allocation5 + $0x70] sm:$0xff]   ;;  %p2009_p10 = scmp.ne.s32.totalorder %s1376_s1, %s2008_s29  ;;  %p2014_p12 = scmp.lt.s32.totalorder %s2008_s29, %s2008_s29 }
  0x22   :  { %589 = vmatprep.mubr.bf16.mxu0 %v1874_v6  ;;  %v1898_v10 = vld [vmem:[#allocation2 + $0x104] ss:$8 sps:$4 sm:$0xff]   ;;  %v1868_v15 = vld [vmem:[#allocation5 + $0x58] sm:$0xff]   ;;  %v1869_v16 = vld [vmem:[#allocation5 + $0x50] sm:$0xff]  }
  0x23   :  { %717 = vmatprep.mubr.bf16.mxu1 %v1898_v10  ;;  %v1866_v13 = vld [vmem:[#allocation5 + $0x68] sm:$0xff]   ;;  %v1867_v14 = vld [vmem:[#allocation5 + $0x60] sm:$0xff]   ;;  %v1875_v21 = vld [vmem:[#allocation2 + $0x14] ss:$8 sps:$4 sm:$0xff]   ;;  %p2015_p13 = por %p2014_p12, %p2013_p11 }
  0x24   :  { %560 = vmatpush1.bf16.msra.mxu0 %v1857_v2  ;;  %1831 = vmatpush1.bf16.msra.mxu1 %v1857_v2  ;;  %v1870_v17 = vld [vmem:[#allocation5 + $0x48] sm:$0xff]   ;;  %v1871_v18 = vld [vmem:[#allocation5 + $0x40] sm:$0xff]   ;;  %v1902_v22 = vld [vmem:[#allocation2 + $0x114] ss:$8 sps:$4 sm:$0xff]  }
  0x25   :  { %561 = vmatprep.subr.bf16.mxu0 %v2082_v0  ;;  %1816 = vmatprep.subr.bf16.mxu1 %v2082_v0  ;;  %v1872_v19 = vld [vmem:[#allocation2] ss:$8 sps:$4 sm:$0xff]   ;;  %v1877_v23 = vld [vmem:[#allocation2 + $0x10] ss:$8 sps:$4 sm:$0xff]   ;;  %v1878_v25 = vld [vmem:[#allocation2 + $0x24] ss:$8 sps:$4 sm:$0xff]   ;;  %p2016_p0 = pnand %p2015_p13, %p2009_p10 }
  0x26   :  { %v1896_v20 = vld [vmem:[#allocation2 + $0x100] ss:$8 sps:$4 sm:$0xff]   ;;  %v1904_v24 = vld [vmem:[#allocation2 + $0x110] ss:$8 sps:$4 sm:$0xff]   ;;  %v1908_v26 = vld [vmem:[#allocation2 + $0x124] ss:$8 sps:$4 sm:$0xff]  }
  0x27   :  { %v1880_v27 = vld [vmem:[#allocation2 + $0x20] ss:$8 sps:$4 sm:$0xff]   ;;  %v1881_v29 = vld [vmem:[#allocation2 + $0x34] ss:$8 sps:$4 sm:$0xff]   ;;  %v1883_v31 = vld [vmem:[#allocation2 + $0x30] ss:$8 sps:$4 sm:$0xff]  }
  0x28   :  { %562 = vmatpush1.bf16.msra.mxu0 %v1858_v3  ;;  %1832 = vmatpush1.bf16.msra.mxu1 %v1858_v3  ;;  %v1910_v28 = vld [vmem:[#allocation2 + $0x120] ss:$8 sps:$4 sm:$0xff]   ;;  %v1914_v30 = vld [vmem:[#allocation2 + $0x134] ss:$8 sps:$4 sm:$0xff]   ;;  %v1916_v32 = vld [vmem:[#allocation2 + $0x130] ss:$8 sps:$4 sm:$0xff]  }
  0x29   :  { %563 = vmatprep.subr.bf16.mxu0 %v2082_v0  ;;  %1817 = vmatprep.subr.bf16.mxu1 %v2082_v0  ;;  %v1884_v33 = vld [vmem:[#allocation2 + $0x44] ss:$8 sps:$4 sm:$0xff]   ;;  %v1886_v35 = vld [vmem:[#allocation2 + $0x40] ss:$8 sps:$4 sm:$0xff]   ;;  %v1887_v37 = vld [vmem:[#allocation2 + $0x54] ss:$8 sps:$4 sm:$0xff]  }
  0x2a   :  { %v1920_v34 = vld [vmem:[#allocation2 + $0x144] ss:$8 sps:$4 sm:$0xff]   ;;  %v1922_v36 = vld [vmem:[#allocation2 + $0x140] ss:$8 sps:$4 sm:$0xff]   ;;  %v1926_v38 = vld [vmem:[#allocation2 + $0x154] ss:$8 sps:$4 sm:$0xff]  }
  0x2b   :  { %v1889_v39 = vld [vmem:[#allocation2 + $0x50] ss:$8 sps:$4 sm:$0xff]   ;;  %v1890_v41 = vld [vmem:[#allocation2 + $0x64] ss:$8 sps:$4 sm:$0xff]   ;;  %v1892_v43 = vld [vmem:[#allocation2 + $0x60] ss:$8 sps:$4 sm:$0xff]  }
  0x2c   :  { %564 = vmatpush1.bf16.msra.mxu0 %v1859_v4  ;;  %1833 = vmatpush1.bf16.msra.mxu1 %v1859_v4  ;;  %v1928_v40 = vld [vmem:[#allocation2 + $0x150] ss:$8 sps:$4 sm:$0xff]   ;;  %v1932_v42 = vld [vmem:[#allocation2 + $0x164] ss:$8 sps:$4 sm:$0xff]   ;;  %v1934_v44 = vld [vmem:[#allocation2 + $0x160] ss:$8 sps:$4 sm:$0xff]  }
  0x2d   :  { %565 = vmatprep.subr.bf16.mxu0 %v2082_v0  ;;  %1818 = vmatprep.subr.bf16.mxu1 %v2082_v0  ;;  %v1893_v45 = vld [vmem:[#allocation2 + $0x74] ss:$8 sps:$4 sm:$0xff]   ;;  %v1895_v47 = vld [vmem:[#allocation2 + $0x70] ss:$8 sps:$4 sm:$0xff]   ;;  %v1899_v49 = vld [vmem:[#allocation2 + $0x84] ss:$8 sps:$4 sm:$0xff]  }
  0x2e   :  { %v1938_v46 = vld [vmem:[#allocation2 + $0x174] ss:$8 sps:$4 sm:$0xff]   ;;  %v1940_v48 = vld [vmem:[#allocation2 + $0x170] ss:$8 sps:$4 sm:$0xff]   ;;  %v1944_v50 = vld [vmem:[#allocation2 + $0x184] ss:$8 sps:$4 sm:$0xff]  }
  0x2f   :  { %v1901_v51 = vld [vmem:[#allocation2 + $0x80] ss:$8 sps:$4 sm:$0xff]   ;;  %v1905_v53 = vld [vmem:[#allocation2 + $0x94] ss:$8 sps:$4 sm:$0xff]   ;;  %v1907_v55 = vld [vmem:[#allocation2 + $0x90] ss:$8 sps:$4 sm:$0xff]  }
  0x30   :  { %566 = vmatpush1.bf16.msra.mxu0 %v1860_v5  ;;  %1834 = vmatpush1.bf16.msra.mxu1 %v1860_v5  ;;  %v1946_v52 = vld [vmem:[#allocation2 + $0x180] ss:$8 sps:$4 sm:$0xff]   ;;  %v1947_v54 = vld [vmem:[#allocation2 + $0x194] ss:$8 sps:$4 sm:$0xff]   ;;  %v1949_v56 = vld [vmem:[#allocation2 + $0x190] ss:$8 sps:$4 sm:$0xff]  }
  0x31   :  { %567 = vmatprep.subr.bf16.mxu0 %v2082_v0  ;;  %1819 = vmatprep.subr.bf16.mxu1 %v2082_v0  ;;  %v1911_v57 = vld [vmem:[#allocation2 + $0xa4] ss:$8 sps:$4 sm:$0xff]   ;;  %v1913_v59 = vld [vmem:[#allocation2 + $0xa0] ss:$8 sps:$4 sm:$0xff]   ;;  %v1917_v61 = vld [vmem:[#allocation2 + $0xb4] ss:$8 sps:$4 sm:$0xff]  }
  0x32   :  { %v1950_v58 = vld [vmem:[#allocation2 + $0x1a4] ss:$8 sps:$4 sm:$0xff]   ;;  %v1952_v60 = vld [vmem:[#allocation2 + $0x1a0] ss:$8 sps:$4 sm:$0xff]   ;;  %v1953_v62 = vld [vmem:[#allocation2 + $0x1b4] ss:$8 sps:$4 sm:$0xff]  }
  0x33   :  { %v1919_v63 = vld [vmem:[#allocation2 + $0xb0] ss:$8 sps:$4 sm:$0xff]   ;;  %v1923_v1 = vld [vmem:[#allocation2 + $0xc4] ss:$8 sps:$4 sm:$0xff]   ;;  %v1925_v3 = vld [vmem:[#allocation2 + $0xc0] ss:$8 sps:$4 sm:$0xff]  }
  0x34   :  { %568 = vmatpush1.bf16.msra.mxu0 %v1861_v7  ;;  %1835 = vmatpush1.bf16.msra.mxu1 %v1861_v7  ;;  %v1956_v2 = vld [vmem:[#allocation2 + $0x1c4] ss:$8 sps:$4 sm:$0xff]   ;;  %v1958_v4 = vld [vmem:[#allocation2 + $0x1c0] ss:$8 sps:$4 sm:$0xff]   ;;  %v1929_v5 = vld [vmem:[#allocation2 + $0xd4] ss:$8 sps:$4 sm:$0xff]  }
  0x35   :  { %569 = vmatprep.subr.bf16.mxu0 %v2082_v0  ;;  %1820 = vmatprep.subr.bf16.mxu1 %v2082_v0  ;;  %v1959_v6 = vld [vmem:[#allocation2 + $0x1d4] ss:$8 sps:$4 sm:$0xff]   ;;  %v1931_v7 = vld [vmem:[#allocation2 + $0xd0] ss:$8 sps:$4 sm:$0xff]   ;;  %v1962_v10 = vld [vmem:[#allocation2 + $0x1e4] ss:$8 sps:$4 sm:$0xff]  }
  0x38   :  { %570 = vmatpush1.bf16.msra.mxu0 %v1862_v8  ;;  %1836 = vmatpush1.bf16.msra.mxu1 %v1862_v8  ;;  %v1961_v8 = vld [vmem:[#allocation2 + $0x1d0] ss:$8 sps:$4 sm:$0xff]  }
  0x39   :  { %571 = vmatprep.subr.bf16.mxu0 %v2082_v0  ;;  %1821 = vmatprep.subr.bf16.mxu1 %v2082_v0 }
  0x3c   :  { %572 = vmatpush1.bf16.msra.mxu0 %v1863_v9  ;;  %1837 = vmatpush1.bf16.msra.mxu1 %v1863_v9  ;;  %v1935_v9 = vld [vmem:[#allocation2 + $0xe4] ss:$8 sps:$4 sm:$0xff]  }
  0x3d   :  { %573 = vmatprep.subr.bf16.mxu0 %v2082_v0  ;;  %1822 = vmatprep.subr.bf16.mxu1 %v2082_v0 }
  0x40   :  { %574 = vmatpush2.bf16.msra.mxu0 %v1864_v11  ;;  %1838 = vmatpush2.bf16.msra.mxu1 %v1864_v11  ;;  %v1937_v11 = vld [vmem:[#allocation2 + $0xe0] ss:$8 sps:$4 sm:$0xff]  }
  0x41   :  { %575 = vmatprep.subr.bf16.mxu0 %v2082_v0  ;;  %1823 = vmatprep.subr.bf16.mxu1 %v2082_v0 }
  0x44   :  { %576 = vmatpush2.bf16.msra.mxu0 %v1865_v12  ;;  %1839 = vmatpush2.bf16.msra.mxu1 %v1865_v12  ;;  %v1964_v12 = vld [vmem:[#allocation2 + $0x1e0] ss:$8 sps:$4 sm:$0xff]  }
  0x45   :  { %577 = vmatprep.subr.bf16.mxu0 %v2082_v0  ;;  %1824 = vmatprep.subr.bf16.mxu1 %v2082_v0 }
  0x48   :  { %578 = vmatpush2.bf16.msra.mxu0 %v1866_v13  ;;  %1840 = vmatpush2.bf16.msra.mxu1 %v1866_v13  ;;  %v1941_v13 = vld [vmem:[#allocation2 + $0xf4] ss:$8 sps:$4 sm:$0xff]  }
  0x49   :  { %579 = vmatprep.subr.bf16.mxu0 %v2082_v0  ;;  %1825 = vmatprep.subr.bf16.mxu1 %v2082_v0 }
  0x4c   :  { %580 = vmatpush2.bf16.msra.mxu0 %v1867_v14  ;;  %1841 = vmatpush2.bf16.msra.mxu1 %v1867_v14  ;;  %v1965_v14 = vld [vmem:[#allocation2 + $0x1f4] ss:$8 sps:$4 sm:$0xff]  }
  0x4d   :  { %581 = vmatprep.subr.bf16.mxu0 %v2082_v0  ;;  %1826 = vmatprep.subr.bf16.mxu1 %v2082_v0 }
  0x50   :  { %582 = vmatpush2.bf16.msra.mxu0 %v1868_v15  ;;  %1842 = vmatpush2.bf16.msra.mxu1 %v1868_v15  ;;  %v1943_v15 = vld [vmem:[#allocation2 + $0xf0] ss:$8 sps:$4 sm:$0xff]  }
  0x51   :  { %583 = vmatprep.subr.bf16.mxu0 %v2082_v0  ;;  %1827 = vmatprep.subr.bf16.mxu1 %v2082_v0 }
  0x54   :  { %584 = vmatpush2.bf16.msra.mxu0 %v1869_v16  ;;  %1843 = vmatpush2.bf16.msra.mxu1 %v1869_v16  ;;  %v1967_v16 = vld [vmem:[#allocation2 + $0x1f0] ss:$8 sps:$4 sm:$0xff]  }
  0x55   :  { %585 = vmatprep.subr.bf16.mxu0 %v2082_v0  ;;  %1828 = vmatprep.subr.bf16.mxu1 %v2082_v0 }
  0x58   :  { %586 = vmatpush2.bf16.msra.mxu0 %v1870_v17  ;;  %1844 = vmatpush2.bf16.msra.mxu1 %v1870_v17 }
  0x59   :  { %587 = vmatprep.subr.bf16.mxu0 %v2082_v0  ;;  %1829 = vmatprep.subr.bf16.mxu1 %v2082_v0  ;;  %v1955_v0 = vld [vmem:[#allocation2 + $0x1b0] ss:$8 sps:$4 sm:$0xff]  }
  0x5c   :  { %588 = vmatpush2.bf16.msra.mxu0 %v1871_v18  ;;  %1845 = vmatpush2.bf16.msra.mxu1 %v1871_v18 }
  0x5f   :  { %590 = vmatmul.mubr.bf16.vlgmr.msra.gmra.mxu0 %v1872_v19  ;;  %718 = vmatmul.mubr.bf16.vlgmr.msra.gmra.mxu1 %v1896_v20 }
  0x60   :  { %597 = vmatprep.mubr.bf16.mxu0 %v1875_v21  ;;  %725 = vmatprep.mubr.bf16.mxu1 %v1902_v22 }
  0x67   :  { %598 = vmatmul.mubr.bf16.gmra.mxu0 %v1877_v23  ;;  %726 = vmatmul.mubr.bf16.gmra.mxu1 %v1904_v24 }
  0x68   :  { %605 = vmatprep.mubr.bf16.mxu0 %v1878_v25  ;;  %733 = vmatprep.mubr.bf16.mxu1 %v1908_v26 }
  0x6f   :  { %606 = vmatmul.mubr.bf16.gmra.mxu0 %v1880_v27  ;;  %734 = vmatmul.mubr.bf16.gmra.mxu1 %v1910_v28 }
  0x70   :  { %613 = vmatprep.mubr.bf16.mxu0 %v1881_v29  ;;  %741 = vmatprep.mubr.bf16.mxu1 %v1914_v30 }
  0x77   :  { %614 = vmatmul.mubr.bf16.gmra.mxu0 %v1883_v31  ;;  %742 = vmatmul.mubr.bf16.gmra.mxu1 %v1916_v32 }
  0x78   :  { %621 = vmatprep.mubr.bf16.mxu0 %v1884_v33  ;;  %749 = vmatprep.mubr.bf16.mxu1 %v1920_v34 }
  0x7f   :  { %622 = vmatmul.mubr.bf16.gmra.mxu0 %v1886_v35  ;;  %750 = vmatmul.mubr.bf16.gmra.mxu1 %v1922_v36 }
  0x80   :  { %629 = vmatprep.mubr.bf16.mxu0 %v1887_v37  ;;  %757 = vmatprep.mubr.bf16.mxu1 %v1926_v38 }
  0x87   :  { %630 = vmatmul.mubr.bf16.gmra.mxu0 %v1889_v39  ;;  %758 = vmatmul.mubr.bf16.gmra.mxu1 %v1928_v40 }
  0x88   :  { %637 = vmatprep.mubr.bf16.mxu0 %v1890_v41  ;;  %765 = vmatprep.mubr.bf16.mxu1 %v1932_v42 }
  0x8f   :  { %638 = vmatmul.mubr.bf16.gmra.mxu0 %v1892_v43  ;;  %766 = vmatmul.mubr.bf16.gmra.mxu1 %v1934_v44 }
  0x90   :  { %645 = vmatprep.mubr.bf16.mxu0 %v1893_v45  ;;  %773 = vmatprep.mubr.bf16.mxu1 %v1938_v46 }
  0x97   :  { %646 = vmatmul.mubr.bf16.gmra.mxu0 %v1895_v47  ;;  %774 = vmatmul.mubr.bf16.gmra.mxu1 %v1940_v48 }
  0x98   :  { %653 = vmatprep.mubr.bf16.mxu0 %v1899_v49  ;;  %781 = vmatprep.mubr.bf16.mxu1 %v1944_v50 }
  0x9f   :  { %654 = vmatmul.mubr.bf16.gmra.mxu0 %v1901_v51  ;;  %782 = vmatmul.mubr.bf16.gmra.mxu1 %v1946_v52 }
  0xa0   :  { %661 = vmatprep.mubr.bf16.mxu0 %v1905_v53  ;;  %789 = vmatprep.mubr.bf16.mxu1 %v1947_v54 }
  0xa7   :  { %662 = vmatmul.mubr.bf16.gmra.mxu0 %v1907_v55  ;;  %790 = vmatmul.mubr.bf16.gmra.mxu1 %v1949_v56 }
  0xa8   :  { %669 = vmatprep.mubr.bf16.mxu0 %v1911_v57  ;;  %797 = vmatprep.mubr.bf16.mxu1 %v1950_v58 }
  0xaf   :  { %670 = vmatmul.mubr.bf16.gmra.mxu0 %v1913_v59  ;;  %798 = vmatmul.mubr.bf16.gmra.mxu1 %v1952_v60 }
  0xb0   :  { %677 = vmatprep.mubr.bf16.mxu0 %v1917_v61  ;;  %805 = vmatprep.mubr.bf16.mxu1 %v1953_v62 }
  0xb7   :  { %678 = vmatmul.mubr.bf16.gmra.mxu0 %v1919_v63  ;;  %806 = vmatmul.mubr.bf16.gmra.mxu1 %v1955_v0 }
  0xb8   :  { %685 = vmatprep.mubr.bf16.mxu0 %v1923_v1  ;;  %813 = vmatprep.mubr.bf16.mxu1 %v1956_v2 }
  0xbf   :  { %686 = vmatmul.mubr.bf16.gmra.mxu0 %v1925_v3  ;;  %814 = vmatmul.mubr.bf16.gmra.mxu1 %v1958_v4 }
  0xc0   :  { %693 = vmatprep.mubr.bf16.mxu0 %v1929_v5  ;;  %821 = vmatprep.mubr.bf16.mxu1 %v1959_v6 }
  0xc7   :  { %694 = vmatmul.mubr.bf16.gmra.mxu0 %v1931_v7  ;;  %822 = vmatmul.mubr.bf16.gmra.mxu1 %v1961_v8 }
  0xc8   :  { %701 = vmatprep.mubr.bf16.mxu0 %v1935_v9  ;;  %829 = vmatprep.mubr.bf16.mxu1 %v1962_v10 }
  0xcf   :  { %702 = vmatmul.mubr.bf16.gmra.mxu0 %v1937_v11  ;;  %830 = vmatmul.mubr.bf16.gmra.mxu1 %v1964_v12 }
  0xd0   :  { %709 = vmatprep.mubr.bf16.mxu0 %v1941_v13  ;;  %837 = vmatprep.mubr.bf16.mxu1 %v1965_v14 }
  0xd7   :  { %710 = vmatmul.mubr.bf16.gmra.mxu0 %v1943_v15  ;;  %838 = vmatmul.mubr.bf16.gmra.mxu1 %v1967_v16 }
 0x11f   :  { %v2152_v17 = vpop.f32.mrf.mxu0  ;;  %v2154_v18 = vpop.f32.mrf.mxu1 }
 0x121   :  { %v593_v19 = vpop.f32.mrf.mxu0  ;;  %v721_v20 = vpop.f32.mrf.mxu1 }
 0x123   :  { %v2156_v21 = vpop.f32.mrf.mxu0  ;;  %v2158_v22 = vpop.f32.mrf.mxu1 }
 0x124   :  { %v1626_v23 = vpack.c.bf16 %v2156_v21, %v2152_v17  ;;  %v1706_v24 = vpack.c.bf16 %v2158_v22, %v2154_v18 }
 0x125   :  { %v596_v25 = vpop.f32.mrf.mxu0  ;;  %v724_v26 = vpop.f32.mrf.mxu1 }
 0x126   :  { %1627 = vst [vmem:[#allocation7] sm:$0xff] %v1626_v23   ;;  %1798 = vst [vmem:[#allocation7 + $0x80] sm:$0xff] %v1706_v24  }
 0x127   :  { %v2164_v27 = vpop.f32.mrf.mxu0  ;;  %v2166_v28 = vpop.f32.mrf.mxu1 }
 0x129   :  { %v601_v29 = vpop.f32.mrf.mxu0  ;;  %v729_v30 = vpop.f32.mrf.mxu1 }
 0x12b   :  { %v2168_v31 = vpop.f32.mrf.mxu0  ;;  %v2170_v32 = vpop.f32.mrf.mxu1 }
 0x12c   :  { %v1631_v33 = vpack.c.bf16 %v2168_v31, %v2164_v27  ;;  %v1711_v34 = vpack.c.bf16 %v2170_v32, %v2166_v28 }
 0x12d   :  { %v604_v35 = vpop.f32.mrf.mxu0  ;;  %v732_v36 = vpop.f32.mrf.mxu1 }
 0x12e   :  { %1783 = vst [vmem:[#allocation7 + $0x8] sm:$0xff] %v1631_v33   ;;  %1799 = vst [vmem:[#allocation7 + $0x88] sm:$0xff] %v1711_v34  }
 0x12f   :  { %v2176_v37 = vpop.f32.mrf.mxu0  ;;  %v2178_v38 = vpop.f32.mrf.mxu1 }
 0x131   :  { %v609_v39 = vpop.f32.mrf.mxu0  ;;  %v737_v40 = vpop.f32.mrf.mxu1 }
 0x133   :  { %v2180_v41 = vpop.f32.mrf.mxu0  ;;  %v2182_v42 = vpop.f32.mrf.mxu1 }
 0x134   :  { %v1636_v43 = vpack.c.bf16 %v2180_v41, %v2176_v37  ;;  %v1716_v44 = vpack.c.bf16 %v2182_v42, %v2178_v38 }
 0x135   :  { %v612_v45 = vpop.f32.mrf.mxu0  ;;  %v740_v46 = vpop.f32.mrf.mxu1 }
 0x136   :  { %1784 = vst [vmem:[#allocation7 + $0x10] sm:$0xff] %v1636_v43   ;;  %1800 = vst [vmem:[#allocation7 + $0x90] sm:$0xff] %v1716_v44   ;;  %v1236_v43 = vmul.f32 %v2156_v21, %v2156_v21  ;;  %v1235_v46 = vmul.f32 %v2152_v17, %v2152_v17 }
 0x137   :  { %v2188_v47 = vpop.f32.mrf.mxu0  ;;  %v2190_v48 = vpop.f32.mrf.mxu1 }
 0x139   :  { %v617_v49 = vpop.f32.mrf.mxu0  ;;  %v745_v50 = vpop.f32.mrf.mxu1 }
 0x13a   :  { %v1237_v49 = vmul.f32 %v2164_v27, %v2164_v27 }
 0x13b   :  { %v2192_v51 = vpop.f32.mrf.mxu0  ;;  %v2194_v52 = vpop.f32.mrf.mxu1 }
 0x13c   :  { %v1641_v53 = vpack.c.bf16 %v2192_v51, %v2188_v47  ;;  %v1721_v54 = vpack.c.bf16 %v2194_v52, %v2190_v48 }
 0x13d   :  { %v620_v55 = vpop.f32.mrf.mxu0  ;;  %v748_v56 = vpop.f32.mrf.mxu1 }
 0x13e   :  { %1785 = vst [vmem:[#allocation7 + $0x18] sm:$0xff] %v1641_v53   ;;  %1801 = vst [vmem:[#allocation7 + $0x98] sm:$0xff] %v1721_v54   ;;  %v1166_v54 = vadd.f32 %v2156_v21, %v2152_v17  ;;  %v1299_v55 = vadd.f32 %v1236_v43, %v1235_v46  ;;  %v1238_v56 = vmul.f32 %v2168_v31, %v2168_v31 }
 0x13f   :  { %v2200_v57 = vpop.f32.mrf.mxu0  ;;  %v2202_v58 = vpop.f32.mrf.mxu1 }
 0x141   :  { %v625_v59 = vpop.f32.mrf.mxu0  ;;  %v753_v60 = vpop.f32.mrf.mxu1 }
 0x143   :  { %v2204_v61 = vpop.f32.mrf.mxu0  ;;  %v2206_v62 = vpop.f32.mrf.mxu1 }
 0x144   :  { %v1646_v63 = vpack.c.bf16 %v2204_v61, %v2200_v57  ;;  %v1726_v0 = vpack.c.bf16 %v2206_v62, %v2202_v58 }
 0x145   :  { %v628_v1 = vpop.f32.mrf.mxu0  ;;  %v756_v2 = vpop.f32.mrf.mxu1 }
 0x146   :  { %1786 = vst [vmem:[#allocation7 + $0x20] sm:$0xff] %v1646_v63   ;;  %1802 = vst [vmem:[#allocation7 + $0xa0] sm:$0xff] %v1726_v0   ;;  %v1167_v63 = vadd.f32 %v1166_v54, %v2164_v27  ;;  %v1300_v0 = vadd.f32 %v1299_v55, %v1237_v49  ;;  %v1239_v1 = vmul.f32 %v2176_v37, %v2176_v37 }
 0x147   :  { %v2212_v3 = vpop.f32.mrf.mxu0  ;;  %v2214_v4 = vpop.f32.mrf.mxu1  ;;  %v1240_v27 = vmul.f32 %v2180_v41, %v2180_v41 }
 0x149   :  { %v633_v5 = vpop.f32.mrf.mxu0  ;;  %v761_v6 = vpop.f32.mrf.mxu1 }
 0x14a   :  { %v1168_v6 = vadd.f32 %v1167_v63, %v2168_v31  ;;  %v1241_v31 = vmul.f32 %v2188_v47, %v2188_v47 }
 0x14b   :  { %v2216_v7 = vpop.f32.mrf.mxu0  ;;  %v2218_v8 = vpop.f32.mrf.mxu1 }
 0x14c   :  { %v1651_v9 = vpack.c.bf16 %v2216_v7, %v2212_v3  ;;  %v1731_v10 = vpack.c.bf16 %v2218_v8, %v2214_v4 }
 0x14d   :  { %v636_v11 = vpop.f32.mrf.mxu0  ;;  %v764_v12 = vpop.f32.mrf.mxu1 }
 0x14e   :  { %1787 = vst [vmem:[#allocation7 + $0x28] sm:$0xff] %v1651_v9   ;;  %1803 = vst [vmem:[#allocation7 + $0xa8] sm:$0xff] %v1731_v10   ;;  %v1301_v9 = vadd.f32 %v1300_v0, %v1238_v56  ;;  %v1169_v12 = vadd.f32 %v1168_v6, %v2176_v37  ;;  %v1246_v6 = vmul.f32 %v2216_v7, %v2216_v7 }
 0x14f   :  { %v2224_v13 = vpop.f32.mrf.mxu0  ;;  %v2226_v14 = vpop.f32.mrf.mxu1 }
 0x151   :  { %v641_v15 = vpop.f32.mrf.mxu0  ;;  %v769_v16 = vpop.f32.mrf.mxu1 }
 0x152   :  { %v1302_v15 = vadd.f32 %v1301_v9, %v1239_v1 }
 0x153   :  { %v2228_v19 = vpop.f32.mrf.mxu0  ;;  %v2230_v20 = vpop.f32.mrf.mxu1 }
 0x154   :  { %v1656_v23 = vpack.c.bf16 %v2228_v19, %v2224_v13  ;;  %v1736_v24 = vpack.c.bf16 %v2230_v20, %v2226_v14 }
 0x155   :  { %v644_v25 = vpop.f32.mrf.mxu0  ;;  %v772_v26 = vpop.f32.mrf.mxu1 }
 0x156   :  { %1788 = vst [vmem:[#allocation7 + $0x30] sm:$0xff] %v1656_v23   ;;  %1804 = vst [vmem:[#allocation7 + $0xb0] sm:$0xff] %v1736_v24   ;;  %v1170_v24 = vadd.f32 %v1169_v12, %v2180_v41  ;;  %v1303_v25 = vadd.f32 %v1302_v15, %v1240_v27  ;;  %v1242_v26 = vmul.f32 %v2192_v51, %v2192_v51 }
 0x157   :  { %v2236_v29 = vpop.f32.mrf.mxu0  ;;  %v2238_v30 = vpop.f32.mrf.mxu1  ;;  %v1247_v27 = vmul.f32 %v2224_v13, %v2224_v13 }
 0x158   :  { %v1171_v37 = vadd.f32 %v1170_v24, %v2188_v47  ;;  %v1244_v47 = vmul.f32 %v2204_v61, %v2204_v61 }
 0x159   :  { %v649_v33 = vpop.f32.mrf.mxu0  ;;  %v777_v34 = vpop.f32.mrf.mxu1 }
 0x15b   :  { %v2240_v35 = vpop.f32.mrf.mxu0  ;;  %v2242_v36 = vpop.f32.mrf.mxu1 }
 0x15c   :  { %v1661_v39 = vpack.c.bf16 %v2240_v35, %v2236_v29  ;;  %v1741_v40 = vpack.c.bf16 %v2242_v36, %v2238_v30 }
 0x15d   :  { %v652_v44 = vpop.f32.mrf.mxu0  ;;  %v780_v45 = vpop.f32.mrf.mxu1 }
 0x15e   :  { %1789 = vst [vmem:[#allocation7 + $0x38] sm:$0xff] %v1661_v39   ;;  %1805 = vst [vmem:[#allocation7 + $0xb8] sm:$0xff] %v1741_v40   ;;  %v1304_v39 = vadd.f32 %v1303_v25, %v1241_v31  ;;  %v1243_v40 = vmul.f32 %v2200_v57, %v2200_v57  ;;  %v1172_v45 = vadd.f32 %v1171_v37, %v2192_v51 }
 0x15f   :  { %v2254_v50 = vpop.f32.mrf.mxu0  ;;  %v2256_v53 = vpop.f32.mrf.mxu1  ;;  %v1245_v51 = vmul.f32 %v2212_v3, %v2212_v3 }
 0x160   :  { %v1305_v49 = vadd.f32 %v1304_v39, %v1242_v26  ;;  %v1173_v56 = vadd.f32 %v1172_v45, %v2200_v57  ;;  %v1250_v45 = vmul.f32 %v2240_v35, %v2240_v35 }
 0x161   :  { %v657_v59 = vpop.f32.mrf.mxu0  ;;  %v785_v60 = vpop.f32.mrf.mxu1 }
 0x162   :  { %v1306_v59 = vadd.f32 %v1305_v49, %v1243_v40  ;;  %v1174_v0 = vadd.f32 %v1173_v56, %v2204_v61 }
 0x163   :  { %v2265_v2 = vpop.f32.mrf.mxu0  ;;  %v2267_v5 = vpop.f32.mrf.mxu1 }
 0x164   :  { %v1666_v17 = vpack.c.bf16 %v2265_v2, %v2254_v50  ;;  %v1746_v21 = vpack.c.bf16 %v2267_v5, %v2256_v53  ;;  %v1307_v1 = vadd.f32 %v1306_v59, %v1244_v47  ;;  %v1175_v57 = vadd.f32 %v1174_v0, %v2212_v3 }
 0x165   :  { %v660_v10 = vpop.f32.mrf.mxu0  ;;  %v788_v11 = vpop.f32.mrf.mxu1  ;;  %v1248_v3 = vmul.f32 %v2228_v19, %v2228_v19  ;;  %v1251_v47 = vmul.f32 %v2254_v50, %v2254_v50  ;;  %v1252_v0 = vmul.f32 %v2265_v2, %v2265_v2 }
 0x166   :  { %1790 = vst [vmem:[#allocation7 + $0x40] sm:$0xff] %v1666_v17   ;;  %1806 = vst [vmem:[#allocation7 + $0xc0] sm:$0xff] %v1746_v21   ;;  %v1308_v9 = vadd.f32 %v1307_v1, %v1245_v51  ;;  %v1176_v12 = vadd.f32 %v1175_v57, %v2216_v7  ;;  %v1249_v7 = vmul.f32 %v2236_v29, %v2236_v29 }
 0x167   :  { %v2279_v16 = vpop.f32.mrf.mxu0  ;;  %v2281_v23 = vpop.f32.mrf.mxu1 }
 0x168   :  { %v1309_v31 = vadd.f32 %v1308_v9, %v1246_v6  ;;  %v1177_v26 = vadd.f32 %v1176_v12, %v2224_v13 }
 0x169   :  { %v665_v33 = vpop.f32.mrf.mxu0  ;;  %v793_v34 = vpop.f32.mrf.mxu1 }
 0x16a   :  { %v1310_v33 = vadd.f32 %v1309_v31, %v1247_v27  ;;  %v1178_v39 = vadd.f32 %v1177_v26, %v2228_v19 }
 0x16b   :  { %v2289_v43 = vpop.f32.mrf.mxu0  ;;  %v2291_v44 = vpop.f32.mrf.mxu1 }
 0x16c   :  { %v1671_v41 = vpack.c.bf16 %v2289_v43, %v2279_v16  ;;  %v1751_v46 = vpack.c.bf16 %v2291_v44, %v2281_v23  ;;  %v1311_v40 = vadd.f32 %v1310_v33, %v1248_v3  ;;  %v1179_v49 = vadd.f32 %v1178_v39, %v2236_v29 }
 0x16d   :  { %v668_v54 = vpop.f32.mrf.mxu0  ;;  %v796_v55 = vpop.f32.mrf.mxu1  ;;  %v1254_v12 = vmul.f32 %v2289_v43, %v2289_v43 }
 0x16e   :  { %1791 = vst [vmem:[#allocation7 + $0x48] sm:$0xff] %v1671_v41   ;;  %1807 = vst [vmem:[#allocation7 + $0xc8] sm:$0xff] %v1751_v46   ;;  %v1312_v13 = vadd.f32 %v1311_v40, %v1249_v7  ;;  %v1180_v56 = vadd.f32 %v1179_v49, %v2240_v35 }
 0x16f   :  { %v2303_v60 = vpop.f32.mrf.mxu0  ;;  %v2305_v63 = vpop.f32.mrf.mxu1 }
 0x170   :  { %v1313_v51 = vadd.f32 %v1312_v13, %v1250_v45  ;;  %v1181_v29 = vadd.f32 %v1180_v56, %v2254_v50  ;;  %v1255_v3 = vmul.f32 %v2303_v60, %v2303_v60 }
 0x171   :  { %v673_v17 = vpop.f32.mrf.mxu0  ;;  %v801_v21 = vpop.f32.mrf.mxu1 }
 0x172   :  { %v1314_v17 = vadd.f32 %v1313_v51, %v1251_v47  ;;  %v1253_v21 = vmul.f32 %v2279_v16, %v2279_v16  ;;  %v1182_v9 = vadd.f32 %v1181_v29, %v2265_v2 }
 0x173   :  { %v2313_v10 = vpop.f32.mrf.mxu0  ;;  %v2315_v11 = vpop.f32.mrf.mxu1 }
 0x174   :  { %v1676_v61 = vpack.c.bf16 %v2313_v10, %v2303_v60  ;;  %v1756_v15 = vpack.c.bf16 %v2315_v11, %v2305_v63  ;;  %v1315_v27 = vadd.f32 %v1314_v17, %v1252_v0  ;;  %v1183_v31 = vadd.f32 %v1182_v9, %v2279_v16 }
 0x175   :  { %v676_v24 = vpop.f32.mrf.mxu0  ;;  %v804_v25 = vpop.f32.mrf.mxu1  ;;  %v1256_v39 = vmul.f32 %v2313_v10, %v2313_v10 }
 0x176   :  { %1792 = vst [vmem:[#allocation7 + $0x50] sm:$0xff] %v1676_v61   ;;  %1808 = vst [vmem:[#allocation7 + $0xd0] sm:$0xff] %v1756_v15   ;;  %v1316_v50 = vadd.f32 %v1315_v27, %v1253_v21  ;;  %v1184_v26 = vadd.f32 %v1183_v31, %v2289_v43 }
 0x177   :  { %v679_v34 = vpop.f32.mrf.mxu0  ;;  %v2327_v37 = vpop.f32.mrf.mxu1 }
 0x178   :  { %v1317_v7 = vadd.f32 %v1316_v50, %v1254_v12  ;;  %v1185_v16 = vadd.f32 %v1184_v26, %v2303_v60 }
 0x179   :  { %v681_v41 = vpop.f32.mrf.mxu0  ;;  %v809_v46 = vpop.f32.mrf.mxu1 }
 0x17a   :  { %v1318_v41 = vadd.f32 %v1317_v7, %v1255_v3  ;;  %v1257_v46 = vmul.f32 %v679_v34, %v679_v34  ;;  %v1186_v43 = vadd.f32 %v1185_v16, %v2313_v10 }
 0x17b   :  { %v682_v54 = vpop.f32.mrf.mxu0  ;;  %v2335_v55 = vpop.f32.mrf.mxu1 }
 0x17c   :  { %v1681_v59 = vpack.c.bf16 %v682_v54, %v679_v34  ;;  %v1761_v19 = vpack.c.bf16 %v2335_v55, %v2327_v37  ;;  %v1319_v47 = vadd.f32 %v1318_v41, %v1256_v39  ;;  %v1258_v56 = vmul.f32 %v682_v54, %v682_v54 }
 0x17d   :  { %v684_v1 = vpop.f32.mrf.mxu0  ;;  %v812_v6 = vpop.f32.mrf.mxu1  ;;  %v1187_v51 = vadd.f32 %v1186_v43, %v679_v34 }
 0x17e   :  { %1793 = vst [vmem:[#allocation7 + $0x58] sm:$0xff] %v1681_v59   ;;  %1809 = vst [vmem:[#allocation7 + $0xd8] sm:$0xff] %v1761_v19   ;;  %v1320_v0 = vadd.f32 %v1319_v47, %v1257_v46 }
 0x17f   :  { %v687_v57 = vpop.f32.mrf.mxu0  ;;  %v2345_v35 = vpop.f32.mrf.mxu1  ;;  %v1188_v60 = vadd.f32 %v1187_v51, %v682_v54 }
 0x180   :  { %v1259_v1 = vmul.f32 %v687_v57, %v687_v57  ;;  %v1321_v9 = vadd.f32 %v1320_v0, %v1258_v56 }
 0x181   :  { %v689_v61 = vpop.f32.mrf.mxu0  ;;  %v817_v15 = vpop.f32.mrf.mxu1  ;;  %v1189_v10 = vadd.f32 %v1188_v60, %v687_v57 }
 0x182   :  { %v1322_v15 = vadd.f32 %v1321_v9, %v1259_v1 }
 0x183   :  { %v690_v24 = vpop.f32.mrf.mxu0  ;;  %v2353_v25 = vpop.f32.mrf.mxu1 }
 0x184   :  { %v1686_v33 = vpack.c.bf16 %v690_v24, %v687_v57  ;;  %v1766_v2 = vpack.c.bf16 %v2353_v25, %v2345_v35  ;;  %v1260_v27 = vmul.f32 %v690_v24, %v690_v24  ;;  %v1190_v3 = vadd.f32 %v1189_v10, %v690_v24 }
 0x185   :  { %v692_v40 = vpop.f32.mrf.mxu0  ;;  %v820_v45 = vpop.f32.mrf.mxu1 }
 0x186   :  { %1794 = vst [vmem:[#allocation7 + $0x60] sm:$0xff] %v1686_v33   ;;  %1810 = vst [vmem:[#allocation7 + $0xe0] sm:$0xff] %v1766_v2   ;;  %v1323_v26 = vadd.f32 %v1322_v15, %v1260_v27 }
 0x187   :  { %v695_v49 = vpop.f32.mrf.mxu0  ;;  %v2361_v13 = vpop.f32.mrf.mxu1 }
 0x188   :  { %v1261_v31 = vmul.f32 %v695_v49, %v695_v49  ;;  %v1191_v7 = vadd.f32 %v1190_v3, %v695_v49 }
 0x189   :  { %v697_v59 = vpop.f32.mrf.mxu0  ;;  %v825_v19 = vpop.f32.mrf.mxu1 }
 0x18a   :  { %v1324_v39 = vadd.f32 %v1323_v26, %v1261_v31  ;;  %v1267_v26 = vmul.f32 %v2154_v18, %v2154_v18 }
 0x18b   :  { %v698_v6 = vpop.f32.mrf.mxu0  ;;  %v2364_v29 = vpop.f32.mrf.mxu1 }
 0x18c   :  { %v1691_v17 = vpack.c.bf16 %v698_v6, %v695_v49  ;;  %v1771_v21 = vpack.c.bf16 %v2364_v29, %v2361_v13  ;;  %v1262_v33 = vmul.f32 %v698_v6, %v698_v6  ;;  %v1192_v41 = vadd.f32 %v1191_v7, %v698_v6 }
 0x18d   :  { %v700_v12 = vpop.f32.mrf.mxu0  ;;  %v828_v61 = vpop.f32.mrf.mxu1 }
 0x18e   :  { %1795 = vst [vmem:[#allocation7 + $0x68] sm:$0xff] %v1691_v17   ;;  %1811 = vst [vmem:[#allocation7 + $0xe8] sm:$0xff] %v1771_v21   ;;  %v1325_v43 = vadd.f32 %v1324_v39, %v1262_v33 }
 0x18f   :  { %v703_v34 = vpop.f32.mrf.mxu0  ;;  %v2368_v50 = vpop.f32.mrf.mxu1 }
 0x190   :  { %v1263_v40 = vmul.f32 %v703_v34, %v703_v34  ;;  %v1193_v24 = vadd.f32 %v1192_v41, %v703_v34 }
 0x191   :  { %v705_v54 = vpop.f32.mrf.mxu0  ;;  %v833_v2 = vpop.f32.mrf.mxu1 }
 0x192   :  { %v1326_v19 = vadd.f32 %v1325_v43, %v1263_v40 }
 0x193   :  { %v706_v45 = vpop.f32.mrf.mxu0  ;;  %v2370_v16 = vpop.f32.mrf.mxu1 }
 0x194   :  { %v1696_v57 = vpack.c.bf16 %v706_v45, %v703_v34  ;;  %v1776_v46 = vpack.c.bf16 %v2370_v16, %v2368_v50  ;;  %v1264_v47 = vmul.f32 %v706_v45, %v706_v45  ;;  %v1194_v0 = vadd.f32 %v1193_v24, %v706_v45 }
 0x195   :  { %v708_v56 = vpop.f32.mrf.mxu0  ;;  %v836_v59 = vpop.f32.mrf.mxu1 }
 0x196   :  { %1796 = vst [vmem:[#allocation7 + $0x70] sm:$0xff] %v1696_v57   ;;  %1812 = vst [vmem:[#allocation7 + $0xf0] sm:$0xff] %v1776_v46   ;;  %v1327_v60 = vadd.f32 %v1326_v19, %v1264_v47 }
 0x197   :  { %v711_v51 = vpop.f32.mrf.mxu0  ;;  %v2374_v49 = vpop.f32.mrf.mxu1 }
 0x198   :  { %v1265_v1 = vmul.f32 %v711_v51, %v711_v51  ;;  %v1195_v21 = vadd.f32 %v1194_v0, %v711_v51 }
 0x199   :  { %v713_v17 = vpop.f32.mrf.mxu0  ;;  %v841_v6 = vpop.f32.mrf.mxu1 }
 0x19a   :  { %v1328_v9 = vadd.f32 %v1327_v60, %v1265_v1 }
 0x19b   :  { %v714_v27 = vpop.f32.mrf.mxu0  ;;  %v2376_v12 = vpop.f32.mrf.mxu1 }
 0x19c   :  { %v1701_v61 = vpack.c.bf16 %v714_v27, %v711_v51  ;;  %v1196_v10 = vadd.f32 %v1195_v21, %v714_v27  ;;  %v1266_v15 = vmul.f32 %v714_v27, %v714_v27  ;;  %v1781_v31 = vpack.c.bf16 %v2376_v12, %v2374_v49 }
 0x19d   :  { %v716_v34 = vpop.f32.mrf.mxu0  ;;  %v844_v3 = vpop.f32.mrf.mxu1 }
 0x19e   :  { %1797 = vst [vmem:[#allocation7 + $0x78] sm:$0xff] %v1701_v61   ;;  %v1197_v33 = vadd.f32 %v1196_v10, %v2154_v18  ;;  %v1329_v54 = vadd.f32 %v1328_v9, %v1266_v15  ;;  %1813 = vst [vmem:[#allocation7 + $0xf8] sm:$0xff] %v1781_v31  }
 0x19f   :  { %2019 = shalt.err (!%p2016_p0)
}
 0x1a0   :  { %1381 = dma.vmem_to_hbm [thread:$0]  %s1376_s1, 4096, %s2490_s2, [#allocation4], %s2080_s25, %s2080_s25, %s2081_s26   ;;  %v1268_v2 = vmul.f32 %v2158_v22, %v2158_v22  ;;  %v1198_v18 = vadd.f32 %v1197_v33, %v2158_v22  ;;  %v1330_v7 = vadd.f32 %v1329_v54, %v1267_v26  ;;  %v1269_v39 = vmul.f32 %v2166_v28, %v2166_v28 }
 0x1a1   :  { %v1270_v41 = vmul.f32 %v2170_v32, %v2170_v32  ;;  %v1271_v43 = vmul.f32 %v2178_v38, %v2178_v38  ;;  %v1272_v22 = vmul.f32 %v2182_v42, %v2182_v42  ;;  %s2084_s2 = smov [#allocation8]   ;;  %s2085_s7 = smov [#allocation10]  }
 0x1a2   :  { %v1199_v40 = vadd.f32 %v1198_v18, %v2166_v28  ;;  %v1331_v45 = vadd.f32 %v1330_v7, %v1268_v2  ;;  %v1273_v28 = vmul.f32 %v2190_v48, %v2190_v48  ;;  %s1388_s6 = sshll.u32 %s2084_s2, 4  ;;  %s1398_s8 = sshll.u32 %s2085_s7, 4  ;;  %s1389_s6 = int_to_ptr.vmem [resolvable:$true] %s1388_s6  ;;  %s1399_s8 = int_to_ptr.vmem [resolvable:$true] %s1398_s8 }
 0x1a3   :  { %s2028_s9 = scalar_lea.vmem %s1389_s6, 128  ;;  %p2033_p2 = scmp.lt.s32.totalorder %s1389_s6, %s1389_s6 }
 0x1a4   :  { %v1200_v57 = vadd.f32 %v1199_v40, %v2170_v32  ;;  %v1332_v46 = vadd.f32 %v1331_v45, %v1269_v39  ;;  %v1274_v32 = vmul.f32 %v2194_v52, %v2194_v52  ;;  %v1284_v39 = vmul.f32 %v2267_v5, %v2267_v5  ;;  %p2029_p1 = scmp.ne.s32.totalorder %s1389_s6, %s2028_s9  ;;  %p2034_p3 = scmp.lt.s32.totalorder %s2028_s9, %s2028_s9 }
 0x1a6   :  { %v1201_v47 = vadd.f32 %v1200_v57, %v2178_v38  ;;  %v1333_v56 = vadd.f32 %v1332_v46, %v1270_v41  ;;  %v1275_v38 = vmul.f32 %v2202_v58, %v2202_v58  ;;  %v1285_v41 = vmul.f32 %v2281_v23, %v2281_v23  ;;  %p2035_p4 = por %p2034_p3, %p2033_p2 }
 0x1a7   :  { %v1286_v46 = vmul.f32 %v2291_v44, %v2291_v44 }
 0x1a8   :  { %v1202_v59 = vadd.f32 %v1201_v47, %v2182_v42  ;;  %v1334_v24 = vadd.f32 %v1333_v56, %v1271_v43  ;;  %v1276_v42 = vmul.f32 %v2206_v62, %v2206_v62  ;;  %v1287_v47 = vmul.f32 %v2305_v63, %v2305_v63  ;;  %p2036_p5 = pnand %p2035_p4, %p2029_p1 }
 0x1aa   :  { %v1203_v19 = vadd.f32 %v1202_v59, %v2190_v48  ;;  %v1335_v51 = vadd.f32 %v1334_v24, %v1272_v22  ;;  %v1277_v48 = vmul.f32 %v2214_v4, %v2214_v4  ;;  %v1288_v22 = vmul.f32 %v2315_v11, %v2315_v11 }
 0x1ab   :  { %v1289_v24 = vmul.f32 %v2327_v37, %v2327_v37 }
 0x1ac   :  { %v1204_v0 = vadd.f32 %v1203_v19, %v2194_v52  ;;  %v1336_v1 = vadd.f32 %v1335_v51, %v1273_v28  ;;  %v1278_v52 = vmul.f32 %v2218_v8, %v2218_v8  ;;  %v1290_v19 = vmul.f32 %v2335_v55, %v2335_v55 }
 0x1ae   :  { %v1337_v60 = vadd.f32 %v1336_v1, %v1274_v32  ;;  %v1205_v17 = vadd.f32 %v1204_v0, %v2202_v58  ;;  %v1279_v58 = vmul.f32 %v2226_v14, %v2226_v14  ;;  %v1291_v32 = vmul.f32 %v2345_v35, %v2345_v35 }
 0x1af   :  { %v1292_v1 = vmul.f32 %v2353_v25, %v2353_v25 }
 0x1b0   :  { %v1206_v6 = vadd.f32 %v1205_v17, %v2206_v62  ;;  %v1338_v21 = vadd.f32 %v1337_v60, %v1275_v38  ;;  %v1280_v62 = vmul.f32 %v2230_v20, %v2230_v20  ;;  %v1293_v60 = vmul.f32 %v2361_v13, %v2361_v13 }
 0x1b2   :  { %v1207_v9 = vadd.f32 %v1206_v6, %v2214_v4  ;;  %v1339_v27 = vadd.f32 %v1338_v21, %v1276_v42  ;;  %v1281_v4 = vmul.f32 %v2238_v30, %v2238_v30  ;;  %v1294_v42 = vmul.f32 %v2364_v29, %v2364_v29 }
 0x1b3   :  { %v1295_v21 = vmul.f32 %v2368_v50, %v2368_v50 }
 0x1b4   :  { %v1208_v61 = vadd.f32 %v1207_v9, %v2218_v8  ;;  %v1340_v10 = vadd.f32 %v1339_v27, %v1277_v48  ;;  %v1282_v8 = vmul.f32 %v2242_v36, %v2242_v36  ;;  %v1296_v9 = vmul.f32 %v2370_v16, %v2370_v16 }
 0x1b6   :  { %v1209_v15 = vadd.f32 %v1208_v61, %v2226_v14  ;;  %v1341_v31 = vadd.f32 %v1340_v10, %v1278_v52  ;;  %v1283_v14 = vmul.f32 %v2256_v53, %v2256_v53  ;;  %v1297_v52 = vmul.f32 %v2374_v49, %v2374_v49 }
 0x1b7   :  { %v1298_v10 = vmul.f32 %v2376_v12, %v2376_v12 }
 0x1b8   :  { %v1210_v34 = vadd.f32 %v1209_v15, %v2230_v20  ;;  %v1342_v3 = vadd.f32 %v1341_v31, %v1279_v58 }
 0x1ba   :  { %v1211_v26 = vadd.f32 %v1210_v34, %v2238_v30  ;;  %v1343_v33 = vadd.f32 %v1342_v3, %v1280_v62 }
 0x1bc   :  { %v1212_v54 = vadd.f32 %v1211_v26, %v2242_v36  ;;  %v1344_v2 = vadd.f32 %v1343_v33, %v1281_v4 }
 0x1be   :  { %v1213_v18 = vadd.f32 %v1212_v54, %v2256_v53  ;;  %v1345_v7 = vadd.f32 %v1344_v2, %v1282_v8 }
 0x1c0   :  { %v1214_v20 = vadd.f32 %v1213_v18, %v2267_v5  ;;  %v1346_v40 = vadd.f32 %v1345_v7, %v1283_v14 }
 0x1c2   :  { %v1347_v30 = vadd.f32 %v1346_v40, %v1284_v39  ;;  %v1215_v45 = vadd.f32 %v1214_v20, %v2281_v23 }
 0x1c4   :  { %v1348_v36 = vadd.f32 %v1347_v30, %v1285_v41  ;;  %v1216_v57 = vadd.f32 %v1215_v45, %v2291_v44 }
 0x1c6   :  { %v1349_v53 = vadd.f32 %v1348_v36, %v1286_v46  ;;  %v1217_v43 = vadd.f32 %v1216_v57, %v2305_v63 }
 0x1c8   :  { %v1350_v5 = vadd.f32 %v1349_v53, %v1287_v47  ;;  %v1218_v56 = vadd.f32 %v1217_v43, %v2315_v11 }
 0x1ca   :  { %v1351_v59 = vadd.f32 %v1350_v5, %v1288_v22  ;;  %v1219_v23 = vadd.f32 %v1218_v56, %v2327_v37 }
 0x1cc   :  { %v1352_v28 = vadd.f32 %v1351_v59, %v1289_v24  ;;  %v1220_v44 = vadd.f32 %v1219_v23, %v2335_v55 }
 0x1ce   :  { %v1353_v51 = vadd.f32 %v1352_v28, %v1290_v19  ;;  %v1221_v63 = vadd.f32 %v1220_v44, %v2345_v35 }
 0x1d0   :  { %v1354_v0 = vadd.f32 %v1353_v51, %v1291_v32  ;;  %v1222_v11 = vadd.f32 %v1221_v63, %v2353_v25 }
 0x1d2   :  { %v1355_v38 = vadd.f32 %v1354_v0, %v1292_v1  ;;  %v1223_v37 = vadd.f32 %v1222_v11, %v2361_v13 }
 0x1d4   :  { %v1356_v17 = vadd.f32 %v1355_v38, %v1293_v60  ;;  %v1224_v55 = vadd.f32 %v1223_v37, %v2364_v29 }
 0x1d6   :  { %v1357_v6 = vadd.f32 %v1356_v17, %v1294_v42  ;;  %v1225_v35 = vadd.f32 %v1224_v55, %v2368_v50 }
 0x1d8   :  { %v1358_v48 = vadd.f32 %v1357_v6, %v1295_v21  ;;  %v1226_v25 = vadd.f32 %v1225_v35, %v2370_v16 }
 0x1da   :  { %v1359_v27 = vadd.f32 %v1358_v48, %v1296_v9  ;;  %v1227_v13 = vadd.f32 %v1226_v25, %v2374_v49 }
 0x1dc   :  { %v1360_v61 = vadd.f32 %v1359_v27, %v1297_v52  ;;  %v1228_v29 = vadd.f32 %v1227_v13, %v2376_v12 }
 0x1de   :  { %v1229_v58 = vrot.slane %v1228_v29, 4  ;;  %v1361_v50 = vadd.f32 %v1360_v61, %v1298_v10 }
 0x1e0   :  { %v1230_v15 = vadd.f32 %v1229_v58, %v1228_v29  ;;  %v1362_v31 = vrot.slane %v1361_v50, 4 }
 0x1e2   :  { %v1231_v62 = vrot.slane %v1230_v15, 2  ;;  %v1363_v34 = vadd.f32 %v1362_v31, %v1361_v50 }
 0x1e4   :  { %v1232_v3 = vadd.f32 %v1231_v62, %v1230_v15  ;;  %v1364_v16 = vrot.slane %v1363_v34, 2 }
 0x1e6   :  { %v1233_v4 = vrot.slane %v1232_v3, 1  ;;  %v1365_v26 = vadd.f32 %v1364_v16, %v1363_v34 }
 0x1e8   :  { %v1234_v49 = vadd.f32 %v1233_v4, %v1232_v3  ;;  %v1366_v33 = vrot.slane %v1365_v26, 1 }
 0x1ea   :  { %1368 = vst [vmem:[#allocation8] sm:$0xff] %v1234_v49  ;;  %v1367_v8 = vadd.f32 %v1366_v33, %v1365_v26 }
 0x1eb   :  { %2039 = shalt.err (!%p2036_p5)
}
 0x1ec   :  { %1391 = dma.vmem_to_hbm [thread:$0]  %s1389_s6, 128, %s2491_s3, [#allocation9]   ;;  %1369 = vst [vmem:[#allocation10] sm:$0xff] %v1367_v8 }
 0x1ed   :  { %s2048_s12 = scalar_lea.vmem %s1399_s8, 128  ;;  %p2053_p7 = scmp.lt.s32.totalorder %s1399_s8, %s1399_s8 }
 0x1ee   :  { %p2049_p6 = scmp.ne.s32.totalorder %s1399_s8, %s2048_s12  ;;  %p2054_p8 = scmp.lt.s32.totalorder %s2048_s12, %s2048_s12 }
 0x1f0   :  { %p2055_p9 = por %p2054_p8, %p2053_p7 }
 0x1f2   :  { %p2056_p10 = pnand %p2055_p9, %p2049_p6 }
 0x1f4   :  { %2059 = shalt.err (!%p2056_p10)
}
 0x1f5   :  { %1401 = dma.vmem_to_hbm [thread:$0]  %s1399_s8, 128, %s2492_s4, [#allocation9]  }
 0x1f6   :  { %2072 = dma.done.wait [#allocation4], 4096  }
 0x1f7   :  { %2073 = vsyncadd [#allocation4], 4294963200 }
 0x1f8   :  { %2074 = dma.done.wait [#allocation9], 256  }
 0x1f9   :  { %2075 = vsyncadd [#allocation9], 4294967040 }
 0x1fa   :  { %1411 = vsyncpa [#allocation3], 1 }
 0x1fb   :  { %1412 = vsyncpa [#allocation6], 1 }
 0x1fc   :  { %1413 = vsyncpa [#allocation4], 1 }
 0x1fd   :  { %1414 = vsyncpa [#allocation9], 1 }

</bundles_post_ra>
